<compile_context>
chip_gen: v7x
topology: tpu7x:2x2x1
jax: 0.10.0
libtpu: 0.0.40
codegen_flags: <defaults>
</compile_context>

<pallas_src>
import jax
import jax.numpy as jnp
from jax.experimental import pallas as pl
from jax.experimental.pallas import tpu as pltpu

EPS = 1e-5
LEAKY_SLOPE = 0.2


# ---------------------------------------------------------------------------
# VMEM-aware tiling helpers
# ---------------------------------------------------------------------------
def _vmem_capacity_bytes():
    """Physical VMEM per TensorCore (generation-aware) with a safe fallback."""
    try:
        cap = getattr(pltpu.get_tpu_info(), "vmem_capacity_bytes", None)
        if cap:
            return int(cap)
    except Exception:
        pass
    return 64 * 1024 * 1024  # conservative: v7x per-TC capacity


def _pick_spatial_tile(hw_pad, c_in, c_out, n_batch, cap=8192):
    """Largest 128-multiple spatial tile that fits the VMEM budget and divides hw_pad."""
    assert hw_pad % 128 == 0
    # f32 bytes per spatial column of working set: double-buffered x and out
    # tiles plus in-kernel temporaries (xr, y, y_norm).
    bytes_per_col = 4 * (2 * c_in + 2 * (c_in + c_out) + c_in + 2 * c_out)
    budget = min(_vmem_capacity_bytes() // 2, 32 * 1024 * 1024)
    t = max(128, min(cap, budget // bytes_per_col, hw_pad))
    t = (t // 128) * 128
    while t > 128 and hw_pad % t:
        t -= 128
    # Keep >=2 total grid steps so both v7x TensorCores get work.
    if n_batch * (hw_pad // t) < 2:
        t2 = t - 128
        while t2 >= 128:
            if hw_pad % t2 == 0:
                t = t2
                break
            t2 -= 128
    return t


# ---------------------------------------------------------------------------
# Kernels
# ---------------------------------------------------------------------------
def _make_stats_kernel(c_out):
    def kernel(x_ref, w_ref, b_ref, stats_ref):
        # stats_ref: (2*C_out, 1) resident accumulator across the spatial axis.
        @pl.when(pl.program_id(1) == 0)
        def _():
            stats_ref[...] = jnp.zeros_like(stats_ref)

        x = x_ref[...]                                            # (C_in, TILE_S)
        xr = jnp.where(x > 0, x, LEAKY_SLOPE * x)                 # VPU
        y = jnp.dot(w_ref[...], xr,
                    preferred_element_type=jnp.float32) + b_ref[...]  # MXU
        stats_ref[:c_out, :] = stats_ref[:c_out, :] + jnp.sum(y, axis=1, keepdims=True)
        stats_ref[c_out:, :] = stats_ref[c_out:, :] + jnp.sum(y * y, axis=1, keepdims=True)
    return kernel


def _make_output_kernel(c_in):
    def kernel(x_ref, w_ref, b_ref, scale_ref, shift_ref, o_ref):
        # o_ref: (C_in + C_out, TILE_S) = [skip x ; BN(y)]
        x = x_ref[...]
        xr = jnp.where(x > 0, x, LEAKY_SLOPE * x)
        y = jnp.dot(w_ref[...], xr,
                    preferred_element_type=jnp.float32) + b_ref[...]
        o_ref[:c_in, :] = x                                       # skip branch
        o_ref[c_in:, :] = (y * scale_ref[...] + shift_ref[...]).astype(o_ref.dtype)
    return kernel


# ---------------------------------------------------------------------------
# Wrapper
# ---------------------------------------------------------------------------
def unet_skip_innermost(x, params):
    """x: (N, C_in, H, W) float32 NCHW.  Returns (N, C_in + C_out, H, W)."""
    wd, bd, wu, bu, gamma, beta = params
    N, C_in, H, W = x.shape
    C_out = wu.shape[0]
    HW = H * W

    # Fold the two bias-separated 1x1 matmuls (no nonlinearity between them in
    # the innermost block): y = W_eff @ lrelu(x) + b_eff.
    w_eff = jnp.dot(wu, wd)                  # (C_out, C_in)
    b_eff = jnp.dot(wu, bd) + bu             # (C_out, 1)

    # Lane-align the spatial axis.  Padded pixels (x==0) produce y == b_eff
    # exactly; their contribution to the BN stats is removed analytically below.
    HW_pad = -(-HW // 128) * 128
    x3 = x.reshape(N, C_in, HW)              # free reshape, stays channel-major
    if HW_pad != HW:
        x3 = jnp.pad(x3, ((0, 0), (0, 0), (0, HW_pad - HW)))

    TILE_S = _pick_spatial_tile(HW_pad, C_in, C_out, N)
    S_TILES = HW_pad // TILE_S
    M = N * HW                               # real pixel count for BN stats
    M_pad = N * HW_pad

    vmem_cap = _vmem_capacity_bytes()
    vmem_limit = min((vmem_cap * 3) // 4, 100 * 1024 * 1024)  # 96MiB v5e/v6e, 48MiB v7x

    x_spec = pl.BlockSpec((None, C_in, TILE_S), lambda n, s: (n, 0, s))
    w_spec = pl.BlockSpec((C_out, C_in), lambda n, s: (0, 0))
    b_spec = pl.BlockSpec((C_out, 1), lambda n, s: (0, 0))

    matmul_flops = 2 * M_pad * C_in * C_out
    x_bytes = x3.size * 4

    # ---- Pass 1: per-batch BN partial sums, accumulated in resident block. ----
    partial = pl.pallas_call(
        _make_stats_kernel(C_out),
        out_shape=jax.ShapeDtypeStruct((N, 2 * C_out, 1), jnp.float32),
        grid=(N, S_TILES),
        in_specs=[x_spec, w_spec, b_spec],
        out_specs=pl.BlockSpec((None, 2 * C_out, 1), lambda n, s: (n, 0, 0)),
        compiler_params=pltpu.CompilerParams(
            dimension_semantics=("parallel", "arbitrary"),
            vmem_limit_bytes=vmem_limit),
        cost_estimate=pl.CostEstimate(
            flops=matmul_flops + 4 * M_pad * C_out, transcendentals=0,
            bytes_accessed=x_bytes + N * 2 * C_out * 4),
    )(x3, w_eff, b_eff)

    # Tiny cross-batch reduction + analytic removal of padded-pixel contribution,
    # then fold training-mode BN (biased batch var over N*H*W) into scale/shift.
    tot = jnp.sum(partial, axis=0)[:, 0]                 # (2*C_out,)
    n_pad_px = N * (HW_pad - HW)
    if n_pad_px:
        be = b_eff[:, 0]
        tot = tot - jnp.concatenate([n_pad_px * be, n_pad_px * be * be])
    mean = tot[:C_out] / M
    var = jnp.maximum(tot[C_out:] / M - mean * mean, 0.0)
    inv_std = jax.lax.rsqrt(var + EPS)
    g = gamma.reshape(-1)
    scale = (g * inv_std).reshape(C_out, 1)
    shift = (beta.reshape(-1) - mean * g * inv_std).reshape(C_out, 1)

    # ---- Pass 2: recompute y, apply folded BN, fused skip-concat output. ----
    sc_spec = pl.BlockSpec((C_out, 1), lambda n, s: (0, 0))
    out3 = pl.pallas_call(
        _make_output_kernel(C_in),
        out_shape=jax.ShapeDtypeStruct((N, C_in + C_out, HW_pad), x.dtype),
        grid=(N, S_TILES),
        in_specs=[x_spec, w_spec, b_spec, sc_spec, sc_spec],
        out_specs=pl.BlockSpec((None, C_in + C_out, TILE_S), lambda n, s: (n, 0, s)),
        compiler_params=pltpu.CompilerParams(
            dimension_semantics=("parallel", "parallel"),
            vmem_limit_bytes=vmem_limit),
        cost_estimate=pl.CostEstimate(
            flops=matmul_flops + 2 * M_pad * C_out, transcendentals=0,
            bytes_accessed=x_bytes + M_pad * (C_in + C_out) * 4),
    )(x3, w_eff, b_eff, scale, shift)

    if HW_pad != HW:
        out3 = out3[:, :, :HW]
    return out3.reshape(N, C_in + C_out, H, W)


# ---------------------------------------------------------------------------
# Params / reference / demo
# ---------------------------------------------------------------------------
def init_params(key, input_nc, inner_nc, outer_nc):
    k1, k2, k3, k4 = jax.random.split(key, 4)
    # Conv2d(input_nc, inner_nc, 1): weight (inner, input, 1, 1) -> Wd (inner, input)
    wd = jax.random.normal(k1, (inner_nc, input_nc), jnp.float32) * 0.1
    bd = jax.random.normal(k2, (inner_nc, 1), jnp.float32) * 0.1
    # ConvTranspose2d(inner_nc, outer_nc, 1): weight (inner, outer, 1, 1)
    #   -> Wu = weight[:, :, 0, 0].T  (outer, inner)
    wu = jax.random.normal(k3, (outer_nc, inner_nc), jnp.float32) * 0.1
    bu = jax.random.normal(k4, (outer_nc, 1), jnp.float32) * 0.1
    # BatchNorm2d(outer_nc) affine params (fresh init: gamma=1, beta=0)
    gamma = jnp.ones((outer_nc, 1), jnp.float32)
    beta = jnp.zeros((outer_nc, 1), jnp.float32)
    return wd, bd, wu, bu, gamma, beta


def _reference(x, params):
    """Pure-JAX reference of the same forward (unfolded weights) for checking."""
    wd, bd, wu, bu, gamma, beta = params
    N, C, H, W = x.shape
    xf = x.reshape(N, C, H * W)
    xr = jnp.where(xf > 0, xf, LEAKY_SLOPE * xf)
    h = jnp.einsum("oc,ncs->nos", wd, xr) + bd[None]
    y = jnp.einsum("oc,ncs->nos", wu, h) + bu[None]
    mean = jnp.mean(y, axis=(0, 2), keepdims=True)
    var = jnp.mean((y - mean) ** 2, axis=(0, 2), keepdims=True)
    yn = (y - mean) / jnp.sqrt(var + EPS) * gamma[None] + beta[None]
    out = jnp.concatenate([xf, yn], axis=1)
    return out.reshape(N, -1, H, W)


if __name__ == "__main__":
    # innermost block: input_nc = outer_nc = 8, inner_nc = 16
    N, C_in, H, W = 2, 8, 16, 16
    inner_nc, outer_nc = 16, 8

    key = jax.random.PRNGKey(0)
    kx, kp = jax.random.split(key)
    x = jax.random.normal(kx, (N, C_in, H, W), jnp.float32)
    params = init_params(kp, C_in, inner_nc, outer_nc)

    fwd = jax.jit(lambda xx, pp: unet_skip_innermost(xx, pp))
    out = jax.block_until_ready(fwd(x, params))

    assert out.shape == (N, C_in + outer_nc, H, W), out.shape
    ref = _reference(x, params)
    err = float(jnp.max(jnp.abs(out - ref)))
    assert err < 1e-4, err

    print("KERNEL_OK")
</pallas_src>

<mosaic_0001>
module attributes {stable_mosaic.version = 11 : i64} {
  func.func @kernel(%arg0: i32, %arg1: i32, %arg2: memref<1x8x256xf32, #tpu.memory_space<vmem>>, %arg3: memref<8x8xf32, #tpu.memory_space<vmem>>, %arg4: memref<8x1xf32, #tpu.memory_space<vmem>>, %arg5: memref<1x16x1xf32, #tpu.memory_space<vmem>>) attributes {dimension_semantics = [#tpu.dimension_semantics<parallel>, #tpu.dimension_semantics<arbitrary>], iteration_bounds = array<i64: 2, 1>, scalar_prefetch = 0 : i64, scratch_operands = 0 : i64, tpu.core_type = #tpu.core_type<tc>, window_params = [{transform_indices = @transform_0, window_bounds = array<i64: 1, 8, 256>}, {pipeline_mode = #tpu.pipeline_mode<synchronous>, transform_indices = @transform_1, window_bounds = array<i64: 8, 8>}, {pipeline_mode = #tpu.pipeline_mode<synchronous>, transform_indices = @transform_2, window_bounds = array<i64: 8, 1>}, {transform_indices = @transform_3, window_bounds = array<i64: 1, 16, 1>}]} {
    %c0_i32 = arith.constant 0 : i32
    %0 = arith.cmpi eq, %arg1, %c0_i32 : i32
    %1 = arith.extui %0 : i1 to i32
    %c0_i32_0 = arith.constant 0 : i32
    %2 = arith.cmpi ne, %1, %c0_i32_0 : i32
    scf.if %2 {
      %cst_22 = arith.constant 0.000000e+00 : f32
      %32 = vector.broadcast %cst_22 : f32 to vector<16x1xf32>
      %c0_23 = arith.constant 0 : index
      %c0_24 = arith.constant 0 : index
      %c0_25 = arith.constant 0 : index
      %33 = vector.load %arg5[%c0_23, %c0_24, %c0_25] : memref<1x16x1xf32, #tpu.memory_space<vmem>>, vector<1x16x1xf32>
      %34 = vector.shape_cast %33 : vector<1x16x1xf32> to vector<16x1xf32>
      %35 = vector.shape_cast %32 : vector<16x1xf32> to vector<1x16x1xf32>
      tpu.vector_store %arg5[%c0_23, %c0_24, %c0_25], %35 {strides = array<i32>} : memref<1x16x1xf32, #tpu.memory_space<vmem>>, vector<1x16x1xf32>,
    } else {
    }
    %c0 = arith.constant 0 : index
    %c0_1 = arith.constant 0 : index
    %c0_2 = arith.constant 0 : index
    %3 = vector.load %arg2[%c0, %c0_1, %c0_2] : memref<1x8x256xf32, #tpu.memory_space<vmem>>, vector<1x8x256xf32>
    %4 = vector.shape_cast %3 : vector<1x8x256xf32> to vector<8x256xf32>
    %cst = arith.constant 0.000000e+00 : f32
    %5 = vector.broadcast %cst : f32 to vector<8x256xf32>
    %6 = arith.cmpf ogt, %4, %5 : vector<8x256xf32>
    %cst_3 = arith.constant 2.000000e-01 : f32
    %7 = vector.broadcast %cst_3 : f32 to vector<8x256xf32>
    %8 = arith.mulf %7, %4 : vector<8x256xf32>
    %9 = arith.select %6, %4, %8 : vector<8x256xi1>, vector<8x256xf32>
    %c0_4 = arith.constant 0 : index
    %c0_5 = arith.constant 0 : index
    %10 = vector.load %arg3[%c0_4, %c0_5] : memref<8x8xf32, #tpu.memory_space<vmem>>, vector<8x8xf32>
    %cst_6 = arith.constant dense<0.000000e+00> : vector<8x256xf32>
    %11 = tpu.matmul %10, %9, %cst_6 {dimension_numbers = #tpu.dot_dimension_numbers<[1], [0], [0], [1], [0, 0, 1, 1], [], []>} : vector<8x8xf32>, vector<8x256xf32>, vector<8x256xf32> -> vector<8x256xf32>
    %c0_7 = arith.constant 0 : index
    %c0_8 = arith.constant 0 : index
    %12 = vector.load %arg4[%c0_7, %c0_8] : memref<8x1xf32, #tpu.memory_space<vmem>>, vector<8x1xf32>
    %13 = vector.broadcast %12 : vector<8x1xf32> to vector<8x256xf32>
    %14 = arith.addf %11, %13 : vector<8x256xf32>
    %c0_9 = arith.constant 0 : index
    %c0_10 = arith.constant 0 : index
    %c0_11 = arith.constant 0 : index
    %15 = vector.load %arg5[%c0_9, %c0_10, %c0_11] : memref<1x16x1xf32, #tpu.memory_space<vmem>>, vector<1x8x1xf32>
    %16 = vector.shape_cast %15 : vector<1x8x1xf32> to vector<8x1xf32>
    %cst_12 = arith.constant dense<0.000000e+00> : vector<8xf32>
    %17 = vector.multi_reduction <add>, %14, %cst_12 [1] : vector<8x256xf32> to vector<8xf32>
    %18 = vector.shape_cast %17 : vector<8xf32> to vector<8x1xf32>
    %19 = arith.addf %16, %18 : vector<8x1xf32>
    %c0_13 = arith.constant 0 : index
    %c0_14 = arith.constant 0 : index
    %c0_15 = arith.constant 0 : index
    %20 = vector.load %arg5[%c0_13, %c0_14, %c0_15] : memref<1x16x1xf32, #tpu.memory_space<vmem>>, vector<1x8x1xf32>
    %21 = vector.shape_cast %20 : vector<1x8x1xf32> to vector<8x1xf32>
    %22 = vector.shape_cast %19 : vector<8x1xf32> to vector<1x8x1xf32>
    tpu.vector_store %arg5[%c0_13, %c0_14, %c0_15], %22 {strides = array<i32>} : memref<1x16x1xf32, #tpu.memory_space<vmem>>, vector<1x8x1xf32>,
    %c0_16 = arith.constant 0 : index
    %c8 = arith.constant 8 : index
    %c0_17 = arith.constant 0 : index
    %23 = vector.load %arg5[%c0_16, %c8, %c0_17] : memref<1x16x1xf32, #tpu.memory_space<vmem>>, vector<1x8x1xf32>
    %24 = vector.shape_cast %23 : vector<1x8x1xf32> to vector<8x1xf32>
    %25 = arith.mulf %14, %14 : vector<8x256xf32>
    %cst_18 = arith.constant dense<0.000000e+00> : vector<8xf32>
    %26 = vector.multi_reduction <add>, %25, %cst_18 [1] : vector<8x256xf32> to vector<8xf32>
    %27 = vector.shape_cast %26 : vector<8xf32> to vector<8x1xf32>
    %28 = arith.addf %24, %27 : vector<8x1xf32>
    %c0_19 = arith.constant 0 : index
    %c8_20 = arith.constant 8 : index
    %c0_21 = arith.constant 0 : index
    %29 = vector.load %arg5[%c0_19, %c8_20, %c0_21] : memref<1x16x1xf32, #tpu.memory_space<vmem>>, vector<1x8x1xf32>
    %30 = vector.shape_cast %29 : vector<1x8x1xf32> to vector<8x1xf32>
    %31 = vector.shape_cast %28 : vector<8x1xf32> to vector<1x8x1xf32>
    tpu.vector_store %arg5[%c0_19, %c8_20, %c0_21], %31 {strides = array<i32>} : memref<1x16x1xf32, #tpu.memory_space<vmem>>, vector<1x8x1xf32>,
    return
  }
  func.func @transform_0(%arg0: i32, %arg1: i32) -> (i32, i32, i32) {
    %c0_i32 = arith.constant 0 : i32
    %c0_i32_0 = arith.constant 0 : i32
    return %arg0, %c0_i32, %arg1 : i32, i32, i32
  }
  func.func @transform_1(%arg0: i32, %arg1: i32) -> (i32, i32) {
    %c0_i32 = arith.constant 0 : i32
    %c0_i32_0 = arith.constant 0 : i32
    %c0_i32_1 = arith.constant 0 : i32
    return %c0_i32, %c0_i32_0 : i32, i32
  }
  func.func @transform_2(%arg0: i32, %arg1: i32) -> (i32, i32) {
    %c0_i32 = arith.constant 0 : i32
    %c0_i32_0 = arith.constant 0 : i32
    %c0_i32_1 = arith.constant 0 : i32
    return %c0_i32, %c0_i32_0 : i32, i32
  }
  func.func @transform_3(%arg0: i32, %arg1: i32) -> (i32, i32, i32) {
    %c0_i32 = arith.constant 0 : i32
    %c0_i32_0 = arith.constant 0 : i32
    %c0_i32_1 = arith.constant 0 : i32
    return %arg0, %c0_i32, %c0_i32_0 : i32, i32, i32
  }
}

module attributes {stable_mosaic.version = 11 : i64} {
  func.func @kernel(%arg0: i32, %arg1: i32, %arg2: memref<1x8x256xf32, #tpu.memory_space<vmem>>, %arg3: memref<8x8xf32, #tpu.memory_space<vmem>>, %arg4: memref<8x1xf32, #tpu.memory_space<vmem>>, %arg5: memref<8x1xf32, #tpu.memory_space<vmem>>, %arg6: memref<8x1xf32, #tpu.memory_space<vmem>>, %arg7: memref<1x16x256xf32, #tpu.memory_space<vmem>>) attributes {dimension_semantics = [#tpu.dimension_semantics<parallel>, #tpu.dimension_semantics<parallel>], iteration_bounds = array<i64: 2, 1>, scalar_prefetch = 0 : i64, scratch_operands = 0 : i64, tpu.core_type = #tpu.core_type<tc>, window_params = [{transform_indices = @transform_0, window_bounds = array<i64: 1, 8, 256>}, {pipeline_mode = #tpu.pipeline_mode<synchronous>, transform_indices = @transform_1, window_bounds = array<i64: 8, 8>}, {pipeline_mode = #tpu.pipeline_mode<synchronous>, transform_indices = @transform_2, window_bounds = array<i64: 8, 1>}, {pipeline_mode = #tpu.pipeline_mode<synchronous>, transform_indices = @transform_3, window_bounds = array<i64: 8, 1>}, {pipeline_mode = #tpu.pipeline_mode<synchronous>, transform_indices = @transform_4, window_bounds = array<i64: 8, 1>}, {transform_indices = @transform_5, window_bounds = array<i64: 1, 16, 256>}]} {
    %c0 = arith.constant 0 : index
    %c0_0 = arith.constant 0 : index
    %c0_1 = arith.constant 0 : index
    %0 = vector.load %arg2[%c0, %c0_0, %c0_1] : memref<1x8x256xf32, #tpu.memory_space<vmem>>, vector<1x8x256xf32>
    %1 = vector.shape_cast %0 : vector<1x8x256xf32> to vector<8x256xf32>
    %cst = arith.constant 0.000000e+00 : f32
    %2 = vector.broadcast %cst : f32 to vector<8x256xf32>
    %3 = arith.cmpf ogt, %1, %2 : vector<8x256xf32>
    %cst_2 = arith.constant 2.000000e-01 : f32
    %4 = vector.broadcast %cst_2 : f32 to vector<8x256xf32>
    %5 = arith.mulf %4, %1 : vector<8x256xf32>
    %6 = arith.select %3, %1, %5 : vector<8x256xi1>, vector<8x256xf32>
    %c0_3 = arith.constant 0 : index
    %c0_4 = arith.constant 0 : index
    %7 = vector.load %arg3[%c0_3, %c0_4] : memref<8x8xf32, #tpu.memory_space<vmem>>, vector<8x8xf32>
    %cst_5 = arith.constant dense<0.000000e+00> : vector<8x256xf32>
    %8 = tpu.matmul %7, %6, %cst_5 {dimension_numbers = #tpu.dot_dimension_numbers<[1], [0], [0], [1], [0, 0, 1, 1], [], []>} : vector<8x8xf32>, vector<8x256xf32>, vector<8x256xf32> -> vector<8x256xf32>
    %c0_6 = arith.constant 0 : index
    %c0_7 = arith.constant 0 : index
    %9 = vector.load %arg4[%c0_6, %c0_7] : memref<8x1xf32, #tpu.memory_space<vmem>>, vector<8x1xf32>
    %10 = vector.broadcast %9 : vector<8x1xf32> to vector<8x256xf32>
    %11 = arith.addf %8, %10 : vector<8x256xf32>
    %c0_8 = arith.constant 0 : index
    %c0_9 = arith.constant 0 : index
    %c0_10 = arith.constant 0 : index
    %12 = vector.load %arg7[%c0_8, %c0_9, %c0_10] : memref<1x16x256xf32, #tpu.memory_space<vmem>>, vector<1x8x256xf32>
    %13 = vector.shape_cast %12 : vector<1x8x256xf32> to vector<8x256xf32>
    %14 = vector.shape_cast %1 : vector<8x256xf32> to vector<1x8x256xf32>
    tpu.vector_store %arg7[%c0_8, %c0_9, %c0_10], %14 {strides = array<i32>} : memref<1x16x256xf32, #tpu.memory_space<vmem>>, vector<1x8x256xf32>,
    %c0_11 = arith.constant 0 : index
    %c0_12 = arith.constant 0 : index
    %15 = vector.load %arg5[%c0_11, %c0_12] : memref<8x1xf32, #tpu.memory_space<vmem>>, vector<8x1xf32>
    %16 = vector.broadcast %15 : vector<8x1xf32> to vector<8x256xf32>
    %17 = arith.mulf %11, %16 : vector<8x256xf32>
    %c0_13 = arith.constant 0 : index
    %c0_14 = arith.constant 0 : index
    %18 = vector.load %arg6[%c0_13, %c0_14] : memref<8x1xf32, #tpu.memory_space<vmem>>, vector<8x1xf32>
    %19 = vector.broadcast %18 : vector<8x1xf32> to vector<8x256xf32>
    %20 = arith.addf %17, %19 : vector<8x256xf32>
    %c0_15 = arith.constant 0 : index
    %c8 = arith.constant 8 : index
    %c0_16 = arith.constant 0 : index
    %21 = vector.load %arg7[%c0_15, %c8, %c0_16] : memref<1x16x256xf32, #tpu.memory_space<vmem>>, vector<1x8x256xf32>
    %22 = vector.shape_cast %21 : vector<1x8x256xf32> to vector<8x256xf32>
    %23 = vector.shape_cast %20 : vector<8x256xf32> to vector<1x8x256xf32>
    tpu.vector_store %arg7[%c0_15, %c8, %c0_16], %23 {strides = array<i32>} : memref<1x16x256xf32, #tpu.memory_space<vmem>>, vector<1x8x256xf32>,
    return
  }
  func.func @transform_0(%arg0: i32, %arg1: i32) -> (i32, i32, i32) {
    %c0_i32 = arith.constant 0 : i32
    %c0_i32_0 = arith.constant 0 : i32
    return %arg0, %c0_i32, %arg1 : i32, i32, i32
  }
  func.func @transform_1(%arg0: i32, %arg1: i32) -> (i32, i32) {
    %c0_i32 = arith.constant 0 : i32
    %c0_i32_0 = arith.constant 0 : i32
    %c0_i32_1 = arith.constant 0 : i32
    return %c0_i32, %c0_i32_0 : i32, i32
  }
  func.func @transform_2(%arg0: i32, %arg1: i32) -> (i32, i32) {
    %c0_i32 = arith.constant 0 : i32
    %c0_i32_0 = arith.constant 0 : i32
    %c0_i32_1 = arith.constant 0 : i32
    return %c0_i32, %c0_i32_0 : i32, i32
  }
  func.func @transform_3(%arg0: i32, %arg1: i32) -> (i32, i32) {
    %c0_i32 = arith.constant 0 : i32
    %c0_i32_0 = arith.constant 0 : i32
    %c0_i32_1 = arith.constant 0 : i32
    return %c0_i32, %c0_i32_0 : i32, i32
  }
  func.func @transform_4(%arg0: i32, %arg1: i32) -> (i32, i32) {
    %c0_i32 = arith.constant 0 : i32
    %c0_i32_0 = arith.constant 0 : i32
    %c0_i32_1 = arith.constant 0 : i32
    return %c0_i32, %c0_i32_0 : i32, i32
  }
  func.func @transform_5(%arg0: i32, %arg1: i32) -> (i32, i32, i32) {
    %c0_i32 = arith.constant 0 : i32
    %c0_i32_0 = arith.constant 0 : i32
    return %arg0, %c0_i32, %arg1 : i32, i32, i32
  }
}

</mosaic_0001>

<bundles_post_ra>
// kernel: _lambda_.3
= control target key start
LH: loop header
LB: loop body
LE: loop exit
PB: predicated region body
PF: predicated region fallthrough
CT: control target
= control target key end

     0   :  { %s559_s18 = smov 0   ;;  %s561_s19 = smov 0   ;;  %s604_s0 = inlined_call_operand.vmem [shape: f32[2,8,256], index: 0, kind: input, shape index: {}]   ;;  %s605_s1 = inlined_call_operand.vmem [shape: f32[8,8], index: 1, kind: input, shape index: {}]   ;;  %s606_s2 = inlined_call_operand.vmem [shape: f32[8,1], index: 2, kind: input, shape index: {}]   ;;  %s607_s3 = inlined_call_operand.vmem [shape: f32[8,1], index: 3, kind: input, shape index: {}]   ;;  %s608_s4 = inlined_call_operand.vmem [shape: f32[8,1], index: 4, kind: input, shape index: {}]   ;;  %s609_s5 = inlined_call_operand.vmem [shape: f32[2,16,256], index: 5, kind: output, shape index: {}]  }
   0x1   :  { %s563_s20 = smov 0  }
   0x2 LB: > { %s27_s21 = sadd.s32 1, %s521_s19  ;;  %p465_p0 = scmp.ge.s32.totalorder %s525_s20, 1  ;;  %s525_s20 = sphi %s563_s20, %s15_s20   ;;  %s521_s19 = sphi %s561_s19, %s611_s19   ;;  %s517_s18 = sphi %s559_s18, %s610_s18  }
   0x3   : > { %p29_p1 = scmp.ge.s32.totalorder %s27_s21, 2  ;;  %p208_p2 = scmp.lt.s32.totalorder %s525_s20, 3 }
   0x5   : > { %s613_s21 = smov (%p29_p1, %s27_s21), 0  ;;  %p209_p3 = pnand %p465_p0, %p208_p2 }
   0x6   : > { %p245_p4 = scmp.lt.s32.totalorder (!%p209_p3), %s517_s18, 1  ;;  %v273_v0 = vld [vmem:[%s606_s2] sm:$0xff] (!%p209_p3)  ;;  %v527_v1 = vmov (!%p209_p3), 0.0   ;;  %v528_v2 = vmov (!%p209_p3), 0   ;;  %vm279_vm2 = vcmask (!%p209_p3), 64512  }
   0x7   : > { %212 = sbr.rel (%p209_p3) target bundleno = 243 (0xf3), region = 40  ;;  %347 = vmatprep.mubr.f32.mxu0 (!%p209_p3), %v527_v1  ;;  %501 = vset.pattern.permute.xlu0 (!%p209_p3), %v528_v2  ;;  %v364_v3 = vld [vmem:[%s608_s4] sm:$0xff] (!%p209_p3) }
   0x8   : > { %276 = vperm.xlu0 (!%p209_p3), %501, %v273_v0   ;;  %502 = vset.pattern.permute.xlu1 (!%p209_p3), %v528_v2  ;;  %v356_v4 = vld [vmem:[%s607_s3] sm:$0xff] (!%p209_p3) }
   0x9   : > { %367 = vperm.xlu1 (!%p209_p3), %502, %v364_v3   ;;  %v272_v11 = vld [vmem:[%s605_s1] sm:$0xff] (!%p209_p3) }
   0xc   : > { %359 = vperm.xlu0 (!%p209_p3), %501, %v356_v4  }
   0xe   : > { %s615_s18 = smov (!%p245_p4, %s517_s18), 1 }
   0xf   : > { %s473_s28 = sshll.u32 %s615_s18, 4  ;;  %s474_s9 = sshll.u32 %s615_s18, 5 }
  0x10   : > { %s252_s6 = scalar_lea.vmem %s604_s0, %s473_s28  ;;  %s262_s12 = scalar_lea.vmem %s609_s5, %s474_s9 }
  0x11   : > { %v265_v5 = vld [vmem:[%s252_s6 + $0x8] sm:$0xff]  ;;  %v264_v6 = vld [vmem:[%s252_s6] sm:$0xff] }
  0x12   : > { %vm267_vm0 = vcmp.gt.f32.partialorder %v265_v5, 0.0  ;;  %v269_v7 = vmul.f32 0.2, %v265_v5  ;;  %vm266_vm1 = vcmp.gt.f32.partialorder %v264_v6, 0.0  ;;  %v268_v8 = vmul.f32 0.2, %v264_v6  ;;  %354 = vst [vmem:[%s262_s12] sm:$0xff] %v264_v6 }
  0x13   : > { %355 = vst [vmem:[%s262_s12 + $0x8] sm:$0xff] %v265_v5 }
  0x14   : > { %v271_v9 = vsel %vm267_vm0, %v265_v5, %v269_v7  ;;  %v270_v10 = vsel %vm266_vm1, %v264_v6, %v268_v8 }
  0x15   : > { %283 = vmatprep.subr.mxu0 %v271_v9 }
  0x16   : > { %284 = vmatpush1.msra.mxu0 %v270_v10 }
  0x17   : > { %470 = vmatmul.mubr.msk.f32.vlgmr.msra.gmra.mrb[0].mxu0 %vm279_vm2, %v272_v11 }
  0x87   : > { %v277_v12 = vpop.permute.xlu0 %276 }
  0x88   : > { %v368_v18 = vpop.permute.xlu1 %367 }
  0x8b   : > { %v360_v16 = vpop.permute.xlu0 %359 }
  0xea   : > { %v349_v13 = vpop.f32.mrb[0].mxu0 }
  0xeb   : > { %v350_v14 = vadd.f32 %v349_v13, %v277_v12  ;;  %v351_v15 = vpop.f32.mrb[1].mxu0 }
  0xec   : > { %v352_v17 = vadd.f32 %v351_v15, %v277_v12 }
  0xed   : > { %v362_v19 = vmul.f32 %v360_v16, %v350_v14 }
  0xee   : > { %v363_v20 = vmul.f32 %v360_v16, %v352_v17 }
  0xef   : > { %v370_v21 = vadd.f32 %v368_v18, %v362_v19 }
  0xf0   : > { %v371_v22 = vadd.f32 %v368_v18, %v363_v20 }
  0xf1   : > { %372 = vst [vmem:[%s262_s12 + $0x10] sm:$0xff] %v370_v21 }
  0xf2   : > { %373 = vst [vmem:[%s262_s12 + $0x18] sm:$0xff] %v371_v22 }
  0xf3 PF: > { %s15_s20 = sadd.s32 1, %s525_s20   ;;  %s610_s18 = smov %s521_s19 }
  0xf4   : > { %p12_p5 = scmp.ge.s32.totalorder %s15_s20, 4   ;;  %s611_s19 = smov %s613_s21 }
  0xf6   :  { %14 = sbr.rel (!%p12_p5) target bundleno = 2 (0x2), region = 70 }

// kernel: _lambda_.2
= control target key start
LH: loop header
LB: loop body
LE: loop exit
PB: predicated region body
PF: predicated region fallthrough
CT: control target
= control target key end

     0   :  { %s467_s12 = smov 0   ;;  %s469_s13 = smov 0   ;;  %s518_s0 = inlined_call_operand.vmem [shape: f32[2,8,256], index: 0, kind: input, shape index: {}]   ;;  %s519_s1 = inlined_call_operand.vmem [shape: f32[8,8], index: 1, kind: input, shape index: {}]   ;;  %s520_s2 = inlined_call_operand.vmem [shape: f32[8,1], index: 2, kind: input, shape index: {}]   ;;  %s521_s3 = inlined_call_operand.vmem [shape: f32[2,16,1], index: 3, kind: output, shape index: {}]  }
   0x1   :  { %s471_s14 = smov 0  }
   0x2 LB: > { %s25_s15 = sadd.s32 1, %s439_s13  ;;  %p384_p0 = scmp.ge.s32.totalorder %s443_s14, 1  ;;  %s443_s14 = sphi %s471_s14, %s13_s14   ;;  %s439_s13 = sphi %s469_s13, %s523_s13   ;;  %s435_s12 = sphi %s467_s12, %s522_s12  }
   0x3   : > { %p27_p1 = scmp.ge.s32.totalorder %s25_s15, 2  ;;  %p156_p2 = scmp.lt.s32.totalorder %s443_s14, 3 }
   0x5   : > { %s525_s15 = smov (%p27_p1, %s25_s15), 0  ;;  %p157_p3 = pnand %p384_p0, %p156_p2 }
   0x6   : > { %p185_p4 = scmp.lt.s32.totalorder (!%p157_p3), %s435_s12, 1  ;;  %v445_v0 = vmov (!%p157_p3), 0.0   ;;  %v446_v1 = vmov (!%p157_p3), 0   ;;  %v215_v2 = vld [vmem:[%s520_s2] sm:$0xff] (!%p157_p3)  ;;  %vm203_vm0 = vcmask (!%p157_p3), 7168   ;;  %vm221_vm3 = vcmask (!%p157_p3), 64512  }
   0x7   : > { %160 = sbr.rel (%p157_p3) target bundleno = 387 (0x183), region = 32  ;;  %289 = vmatprep.mubr.f32.mxu0 (!%p157_p3), %v445_v0  ;;  %420 = vset.pattern.permute.xlu0 (!%p157_p3), %v446_v1  ;;  %v214_v9 = vld [vmem:[%s519_s1] sm:$0xff] (!%p157_p3) }
   0x8   : > { %218 = vperm.xlu0 (!%p157_p3), %420, %v215_v2  }
   0xe   : > { %s527_s12 = smov (!%p185_p4, %s435_s12), 1 }
   0xf   : > { %s392_s18 = sshll.u32 %s527_s12, 4 }
  0x10   : > { %s192_s21 = scalar_lea.vmem %s518_s0, %s392_s18  ;;  %s494_s24 = scalar_lea.vmem %s521_s3, %s392_s18 }
  0x11   : > { %v207_v3 = vld [vmem:[%s192_s21 + $0x8] sm:$0xff]  ;;  %v206_v4 = vld [vmem:[%s192_s21] sm:$0xff]  ;;  %204 = vst.msk [vmem:[%s494_s24] sm:$0xff] %vm203_vm0, %v445_v0  ;;  %205 = vst.msk [vmem:[%s494_s24 + $0x8] sm:$0xff] %vm203_vm0, %v445_v0 }
  0x12   : > { %vm209_vm1 = vcmp.gt.f32.partialorder %v207_v3, 0.0  ;;  %v211_v5 = vmul.f32 0.2, %v207_v3  ;;  %vm208_vm2 = vcmp.gt.f32.partialorder %v206_v4, 0.0  ;;  %v210_v6 = vmul.f32 0.2, %v206_v4 }
  0x14   : > { %v213_v7 = vsel %vm209_vm1, %v207_v3, %v211_v5  ;;  %v212_v8 = vsel %vm208_vm2, %v206_v4, %v210_v6 }
  0x15   : > { %225 = vmatprep.subr.mxu0 %v213_v7 }
  0x16   : > { %226 = vmatpush1.msra.mxu0 %v212_v8 }
  0x17   : > { %389 = vmatmul.mubr.msk.f32.vlgmr.msra.gmra.mrb[0].mxu0 %vm221_vm3, %v214_v9 }
  0x18   : > { %v296_v19 = vld [vmem:[%s494_s24] sm:$0xff]  ;;  %v303_v21 = vld [vmem:[%s494_s24 + $0x8] sm:$0xff] }
  0x87   : > { %v219_v10 = vpop.permute.xlu0 %218 }
  0xea   : > { %v291_v11 = vpop.f32.mrb[0].mxu0 }
  0xeb   : > { %v292_v12 = vadd.f32 %v291_v11, %v219_v10  ;;  %v293_v13 = vpop.f32.mrb[1].mxu0 }
  0xec   : > { %v294_v14 = vadd.f32 %v293_v13, %v219_v10 }
  0xed   : > { %v304_v15 = vmul.f32 %v292_v12, %v292_v12 }
  0xee   : > { %v297_v16 = vadd.f32 %v294_v14, %v292_v12  ;;  %v305_v17 = vmul.f32 %v294_v14, %v294_v14 }
  0xf0   : > { %298 = vadd.xlane.f32.xlu0 %v297_v16  ;;  %v306_v18 = vadd.f32 %v305_v17, %v304_v15 }
  0xf2   : > { %307 = vadd.xlane.f32.xlu1 %v306_v18 }
 0x17d   : > { %v299_v20 = vpop.xlane.xlu0 %298 }
 0x17e   : > { %v300_v22 = vadd.f32 %v299_v20, %v296_v19 }
 0x17f   : > { %v308_v23 = vpop.xlane.xlu1 %307 }
 0x180   : > { %302 = vst.msk [vmem:[%s494_s24] sm:$0xff] %vm203_vm0, %v300_v22  ;;  %v309_v24 = vadd.f32 %v308_v23, %v303_v21 }
 0x182   : > { %310 = vst.msk [vmem:[%s494_s24 + $0x8] sm:$0xff] %vm203_vm0, %v309_v24 }
 0x183 PF: > { %s13_s14 = sadd.s32 1, %s443_s14   ;;  %s522_s12 = smov %s439_s13 }
 0x184   : > { %p10_p5 = scmp.ge.s32.totalorder %s13_s14, 4   ;;  %s523_s13 = smov %s525_s15 }
 0x186   :  { %12 = sbr.rel (!%p10_p5) target bundleno = 2 (0x2), region = 66 }

</bundles_post_ra>
